<compile_context>
chip_gen: v5e
topology: v5e:2x2
jax: 0.10.0
libtpu: 0.0.40
codegen_flags: <defaults>
</compile_context>

<pallas_src>
import functools

import jax
import jax.numpy as jnp
from jax.experimental import pallas as pl
from jax.experimental.pallas import tpu as pltpu

LANE = 128
_BF16 = jnp.bfloat16
_F32 = jnp.float32


def _round_up(x, m):
    return (x + m - 1) // m * m


# ----------------------------- kernel helpers ------------------------------ #

def _layer_norm(x, gamma, beta, h_real, eps=1e-5):
    # x is zero in the padded lanes, so sums over the padded width equal sums
    # over the true hidden width.  Use E[x^2] - mu^2 so padded lanes do not
    # perturb the variance; gamma/beta are zero-padded -> padded lanes stay 0.
    inv_h = 1.0 / float(h_real)
    mu = jnp.sum(x, axis=-1, keepdims=True) * inv_h
    var = jnp.sum(x * x, axis=-1, keepdims=True) * inv_h - mu * mu
    inv = jax.lax.rsqrt(var + eps)
    return (x - mu) * inv * gamma + beta


def _linear(x, w_ref, b_ref):
    # y = x @ W + b ; bf16 operands on the MXU, f32 accumulation, f32 bias add.
    y = jax.lax.dot_general(
        x.astype(_BF16), w_ref[...],
        (((1,), (0,)), ((), ())),
        preferred_element_type=_F32)
    return y + b_ref[...]


def _attention(q_t, k_t, v_t):
    # scores = q_t @ k_t^T with the transpose folded into dot_general
    # (contract the last dim of both operands) -> no XLU transpose.
    scores = jax.lax.dot_general(
        q_t.astype(_BF16), k_t.astype(_BF16),
        (((1,), (1,)), ((), ())),
        preferred_element_type=_F32)
    scores = scores - jnp.max(scores, axis=-1, keepdims=True)
    e = jnp.exp(scores)
    attn = e * pl.reciprocal(jnp.sum(e, axis=-1, keepdims=True), approx=True)
    return jax.lax.dot_general(
        attn.astype(_BF16), v_t.astype(_BF16),
        (((1,), (0,)), ((), ())),
        preferred_element_type=_F32)


# --------------------------------- kernel ---------------------------------- #

def cross_transformer2_kernel(
    q1_ref, k_ref, v_ref, q2_ref,
    wq_ref, bq_ref, wk_ref, bk_ref, wv_ref, bv_ref,
    w1_ref, b1_ref, w2_ref, b2_ref,
    ln_g_ref, ln_b_ref,
    out_ref, *, hidden_dim):
    query1 = q1_ref[...]          # [Nq1, Hp] f32 (zero-padded lanes)
    key = k_ref[...]              # [Nk,  Hp]
    value = v_ref[...]            # [Nk,  Hp]
    query2 = q2_ref[...]          # [Nq2, Hp]
    gamma = ln_g_ref[...]         # [1, Hp] f32 (padded lanes = 0)
    beta = ln_b_ref[...]          # [1, Hp] f32 (padded lanes = 0)

    # --- stage 1: attend query1 over (key, value) ---
    q1_t = _linear(query1, wq_ref, bq_ref)
    k1_t = _linear(key, wk_ref, bk_ref)
    v1_t = _linear(value, wv_ref, bv_ref)
    out1 = _attention(q1_t, k1_t, v1_t)
    attn_out1 = _layer_norm(out1 + query1, gamma, beta, hidden_dim)

    # --- stage 2: attend query2 over (attn_out1, attn_out1), same layers ---
    q2_t = _linear(query2, wq_ref, bq_ref)
    k2_t = _linear(attn_out1, wk_ref, bk_ref)
    v2_t = _linear(attn_out1, wv_ref, bv_ref)
    out2 = _attention(q2_t, k2_t, v2_t)
    attn_out2 = _layer_norm(out2 + query2, gamma, beta, hidden_dim)

    # --- MLP: Linear(H->128) -> ReLU -> Linear(128->H) ---
    h = jnp.maximum(_linear(attn_out2, w1_ref, b1_ref), 0.0)
    mlp_out = _linear(h, w2_ref, b2_ref)

    # final = LayerNorm(mlp_out + attn_out2)   (same LayerNorm params)
    out_ref[...] = _layer_norm(mlp_out + attn_out2, gamma, beta,
                               hidden_dim).astype(out_ref.dtype)


# -------------------------------- wrapper ----------------------------------- #

def _pad2(x, rows, cols):
    return jnp.pad(x, ((0, rows - x.shape[0]), (0, cols - x.shape[1])))


def prepare_params(params, hidden_dim, mlp_dim=128):
    """Zero-pad to lane width (128) and cast matmul weights to bf16."""
    hp = max(LANE, _round_up(hidden_dim, LANE))
    mp = max(LANE, _round_up(mlp_dim, LANE))

    def w(x, r, c):
        return _pad2(x, r, c).astype(_BF16)

    def b(x, c):
        return _pad2(x, 1, c).astype(_F32)

    return dict(
        wq=w(params["wq"], hp, hp), bq=b(params["bq"], hp),
        wk=w(params["wk"], hp, hp), bk=b(params["bk"], hp),
        wv=w(params["wv"], hp, hp), bv=b(params["bv"], hp),
        w1=w(params["w1"], hp, mp), b1=b(params["b1"], mp),
        w2=w(params["w2"], mp, hp), b2=b(params["b2"], hp),
        ln_g=_pad2(params["ln_g"], 1, hp).astype(_F32),
        ln_b=_pad2(params["ln_b"], 1, hp).astype(_F32),
    )


@functools.partial(jax.jit, static_argnames=("hidden_dim",))
def cross_transformer2(query1, key, value, query2, padded_params, hidden_dim):
    hp = padded_params["wq"].shape[0]
    nq2 = query2.shape[0]

    def pad_act(x):
        return jnp.pad(x.astype(_F32), ((0, 0), (0, hp - x.shape[1])))

    q1p, kp_, vp_, q2p = (pad_act(query1), pad_act(key),
                          pad_act(value), pad_act(query2))

    vmem = pl.BlockSpec(memory_space=pltpu.MemorySpace.VMEM)
    args = (
        q1p, kp_, vp_, q2p,
        padded_params["wq"], padded_params["bq"],
        padded_params["wk"], padded_params["bk"],
        padded_params["wv"], padded_params["bv"],
        padded_params["w1"], padded_params["b1"],
        padded_params["w2"], padded_params["b2"],
        padded_params["ln_g"], padded_params["ln_b"],
    )
    out_padded = pl.pallas_call(
        functools.partial(cross_transformer2_kernel, hidden_dim=hidden_dim),
        out_shape=jax.ShapeDtypeStruct((nq2, hp), _F32),
        in_specs=[vmem] * len(args),
        out_specs=vmem,
        compiler_params=pltpu.CompilerParams(
            vmem_limit_bytes=32 * 1024 * 1024),
    )(*args)
    return out_padded[:, :hidden_dim]


# ------------------------------ reference & init ---------------------------- #

def init_params(key, hidden_dim, mlp_dim=128):
    """Deterministic synthetic parameters; Linear weights stored as [in, out]."""
    ks = jax.random.split(key, 10)

    def lin(kw, kb, d_in, d_out):
        bound = 1.0 / jnp.sqrt(d_in)
        w = jax.random.uniform(kw, (d_in, d_out), _F32, -bound, bound)
        b = jax.random.uniform(kb, (1, d_out), _F32, -bound, bound)
        return w, b

    wq, bq = lin(ks[0], ks[1], hidden_dim, hidden_dim)
    wk, bk = lin(ks[2], ks[3], hidden_dim, hidden_dim)
    wv, bv = lin(ks[4], ks[5], hidden_dim, hidden_dim)
    w1, b1 = lin(ks[6], ks[7], hidden_dim, mlp_dim)
    w2, b2 = lin(ks[8], ks[9], mlp_dim, hidden_dim)
    ln_g = jnp.ones((1, hidden_dim), _F32)
    ln_b = jnp.zeros((1, hidden_dim), _F32)
    return dict(wq=wq, bq=bq, wk=wk, bk=bk, wv=wv, bv=bv,
                w1=w1, b1=b1, w2=w2, b2=b2, ln_g=ln_g, ln_b=ln_b)


def reference(query1, key, value, query2, p):
    """Pure-JAX f32 mirror of the PyTorch Cross_Transformer2.forward."""
    def lin(x, w, b):
        return x @ w + b

    def ln(x, g, b, eps=1e-5):
        mu = x.mean(-1, keepdims=True)
        xc = x - mu
        var = (xc * xc).mean(-1, keepdims=True)
        return xc / jnp.sqrt(var + eps) * g + b

    def attn(q, k, v):
        s = jax.nn.softmax(q @ k.T, axis=-1)
        return s @ v

    q1t = lin(query1, p["wq"], p["bq"])
    k1t = lin(key, p["wk"], p["bk"])
    v1t = lin(value, p["wv"], p["bv"])
    ao1 = ln(attn(q1t, k1t, v1t) + query1, p["ln_g"], p["ln_b"])
    q2t = lin(query2, p["wq"], p["bq"])
    k2t = lin(ao1, p["wk"], p["bk"])
    v2t = lin(ao1, p["wv"], p["bv"])
    ao2 = ln(attn(q2t, k2t, v2t) + query2, p["ln_g"], p["ln_b"])
    h = jax.nn.relu(lin(ao2, p["w1"], p["b1"]))
    mlp = lin(h, p["w2"], p["b2"])
    return ln(mlp + ao2, p["ln_g"], p["ln_b"])


if __name__ == "__main__":
    hidden_dim = 32
    seq_q1 = 8
    seq_kv = 8
    seq_q2 = 8

    root = jax.random.PRNGKey(0)
    k1, k2, k3, k4, kp = jax.random.split(root, 5)
    query1 = jax.random.normal(k1, (seq_q1, hidden_dim), _F32)
    key_in = jax.random.normal(k2, (seq_kv, hidden_dim), _F32)
    value = jax.random.normal(k3, (seq_kv, hidden_dim), _F32)
    query2 = jax.random.normal(k4, (seq_q2, hidden_dim), _F32)

    params = init_params(kp, hidden_dim)
    padded_params = prepare_params(params, hidden_dim)

    out = cross_transformer2(query1, key_in, value, query2, padded_params,
                             hidden_dim)
    jax.block_until_ready(out)
    assert out.shape == (seq_q2, hidden_dim)

    ref = reference(query1, key_in, value, query2, params)
    max_err = float(jnp.max(jnp.abs(out - ref)))
    # bf16 MXU operands + approx EUP reciprocal -> small numeric drift only.
    assert max_err < 0.15, f"max abs error vs f32 reference: {max_err}"

    print("KERNEL_OK")
</pallas_src>

<mosaic_0001>
module attributes {stable_mosaic.version = 11 : i64} {
  func.func @cross_transformer2_kernel(%arg0: memref<8x128xf32, #tpu.memory_space<vmem>>, %arg1: memref<8x128xf32, #tpu.memory_space<vmem>>, %arg2: memref<8x128xf32, #tpu.memory_space<vmem>>, %arg3: memref<8x128xf32, #tpu.memory_space<vmem>>, %arg4: memref<128x128xbf16, #tpu.memory_space<vmem>>, %arg5: memref<1x128xf32, #tpu.memory_space<vmem>>, %arg6: memref<128x128xbf16, #tpu.memory_space<vmem>>, %arg7: memref<1x128xf32, #tpu.memory_space<vmem>>, %arg8: memref<128x128xbf16, #tpu.memory_space<vmem>>, %arg9: memref<1x128xf32, #tpu.memory_space<vmem>>, %arg10: memref<128x128xbf16, #tpu.memory_space<vmem>>, %arg11: memref<1x128xf32, #tpu.memory_space<vmem>>, %arg12: memref<128x128xbf16, #tpu.memory_space<vmem>>, %arg13: memref<1x128xf32, #tpu.memory_space<vmem>>, %arg14: memref<1x128xf32, #tpu.memory_space<vmem>>, %arg15: memref<1x128xf32, #tpu.memory_space<vmem>>, %arg16: memref<8x128xf32, #tpu.memory_space<vmem>>) attributes {dimension_semantics = [], scalar_prefetch = 0 : i64, scratch_operands = 0 : i64, tpu.core_type = #tpu.core_type<tc>} {
    %c0 = arith.constant 0 : index
    %c0_0 = arith.constant 0 : index
    %0 = vector.load %arg0[%c0, %c0_0] : memref<8x128xf32, #tpu.memory_space<vmem>>, vector<8x128xf32>
    %c0_1 = arith.constant 0 : index
    %c0_2 = arith.constant 0 : index
    %1 = vector.load %arg1[%c0_1, %c0_2] : memref<8x128xf32, #tpu.memory_space<vmem>>, vector<8x128xf32>
    %c0_3 = arith.constant 0 : index
    %c0_4 = arith.constant 0 : index
    %2 = vector.load %arg2[%c0_3, %c0_4] : memref<8x128xf32, #tpu.memory_space<vmem>>, vector<8x128xf32>
    %c0_5 = arith.constant 0 : index
    %c0_6 = arith.constant 0 : index
    %3 = vector.load %arg3[%c0_5, %c0_6] : memref<8x128xf32, #tpu.memory_space<vmem>>, vector<8x128xf32>
    %c0_7 = arith.constant 0 : index
    %c0_8 = arith.constant 0 : index
    %4 = vector.load %arg14[%c0_7, %c0_8] : memref<1x128xf32, #tpu.memory_space<vmem>>, vector<1x128xf32>
    %c0_9 = arith.constant 0 : index
    %c0_10 = arith.constant 0 : index
    %5 = vector.load %arg15[%c0_9, %c0_10] : memref<1x128xf32, #tpu.memory_space<vmem>>, vector<1x128xf32>
    %6 = arith.truncf %0 : vector<8x128xf32> to vector<8x128xbf16>
    %c0_11 = arith.constant 0 : index
    %c0_12 = arith.constant 0 : index
    %7 = vector.load %arg4[%c0_11, %c0_12] : memref<128x128xbf16, #tpu.memory_space<vmem>>, vector<128x128xbf16>
    %cst = arith.constant dense<0.000000e+00> : vector<8x128xf32>
    %8 = tpu.matmul %6, %7, %cst {dimension_numbers = #tpu.dot_dimension_numbers<[1], [0], [0], [1], [0, 0, 1, 1], [], []>} : vector<8x128xbf16>, vector<128x128xbf16>, vector<8x128xf32> -> vector<8x128xf32>
    %c0_13 = arith.constant 0 : index
    %c0_14 = arith.constant 0 : index
    %9 = vector.load %arg5[%c0_13, %c0_14] : memref<1x128xf32, #tpu.memory_space<vmem>>, vector<1x128xf32>
    %10 = vector.broadcast %9 : vector<1x128xf32> to vector<8x128xf32>
    %11 = arith.addf %8, %10 : vector<8x128xf32>
    %12 = arith.truncf %1 : vector<8x128xf32> to vector<8x128xbf16>
    %c0_15 = arith.constant 0 : index
    %c0_16 = arith.constant 0 : index
    %13 = vector.load %arg6[%c0_15, %c0_16] : memref<128x128xbf16, #tpu.memory_space<vmem>>, vector<128x128xbf16>
    %cst_17 = arith.constant dense<0.000000e+00> : vector<8x128xf32>
    %14 = tpu.matmul %12, %13, %cst_17 {dimension_numbers = #tpu.dot_dimension_numbers<[1], [0], [0], [1], [0, 0, 1, 1], [], []>} : vector<8x128xbf16>, vector<128x128xbf16>, vector<8x128xf32> -> vector<8x128xf32>
    %c0_18 = arith.constant 0 : index
    %c0_19 = arith.constant 0 : index
    %15 = vector.load %arg7[%c0_18, %c0_19] : memref<1x128xf32, #tpu.memory_space<vmem>>, vector<1x128xf32>
    %16 = vector.broadcast %15 : vector<1x128xf32> to vector<8x128xf32>
    %17 = arith.addf %14, %16 : vector<8x128xf32>
    %18 = arith.truncf %2 : vector<8x128xf32> to vector<8x128xbf16>
    %c0_20 = arith.constant 0 : index
    %c0_21 = arith.constant 0 : index
    %19 = vector.load %arg8[%c0_20, %c0_21] : memref<128x128xbf16, #tpu.memory_space<vmem>>, vector<128x128xbf16>
    %cst_22 = arith.constant dense<0.000000e+00> : vector<8x128xf32>
    %20 = tpu.matmul %18, %19, %cst_22 {dimension_numbers = #tpu.dot_dimension_numbers<[1], [0], [0], [1], [0, 0, 1, 1], [], []>} : vector<8x128xbf16>, vector<128x128xbf16>, vector<8x128xf32> -> vector<8x128xf32>
    %c0_23 = arith.constant 0 : index
    %c0_24 = arith.constant 0 : index
    %21 = vector.load %arg9[%c0_23, %c0_24] : memref<1x128xf32, #tpu.memory_space<vmem>>, vector<1x128xf32>
    %22 = vector.broadcast %21 : vector<1x128xf32> to vector<8x128xf32>
    %23 = arith.addf %20, %22 : vector<8x128xf32>
    %24 = arith.truncf %11 : vector<8x128xf32> to vector<8x128xbf16>
    %25 = arith.truncf %17 : vector<8x128xf32> to vector<8x128xbf16>
    %cst_25 = arith.constant dense<0.000000e+00> : vector<8x8xf32>
    %26 = tpu.matmul %24, %25, %cst_25 {dimension_numbers = #tpu.dot_dimension_numbers<[1], [1], [0], [0], [0, 0, 1, 0], [], []>} : vector<8x128xbf16>, vector<8x128xbf16>, vector<8x8xf32> -> vector<8x8xf32>
    %cst_26 = arith.constant dense<0xFF800000> : vector<8xf32>
    %27 = vector.multi_reduction <maximumf>, %26, %cst_26 [1] : vector<8x8xf32> to vector<8xf32>
    %28 = vector.shape_cast %27 : vector<8xf32> to vector<8x1xf32>
    %29 = vector.broadcast %28 : vector<8x1xf32> to vector<8x8xf32>
    %30 = arith.subf %26, %29 : vector<8x8xf32>
    %31 = math.exp %30 : vector<8x8xf32>
    %cst_27 = arith.constant dense<0.000000e+00> : vector<8xf32>
    %32 = vector.multi_reduction <add>, %31, %cst_27 [1] : vector<8x8xf32> to vector<8xf32>
    %33 = vector.shape_cast %32 : vector<8xf32> to vector<8x1xf32>
    %34 = tpu.reciprocal %33 {approx = true} : vector<8x1xf32> -> vector<8x1xf32>
    %35 = vector.broadcast %34 : vector<8x1xf32> to vector<8x8xf32>
    %36 = arith.mulf %31, %35 : vector<8x8xf32>
    %37 = arith.truncf %36 : vector<8x8xf32> to vector<8x8xbf16>
    %38 = arith.truncf %23 : vector<8x128xf32> to vector<8x128xbf16>
    %cst_28 = arith.constant dense<0.000000e+00> : vector<8x128xf32>
    %39 = tpu.matmul %37, %38, %cst_28 {dimension_numbers = #tpu.dot_dimension_numbers<[1], [0], [0], [1], [0, 0, 1, 1], [], []>} : vector<8x8xbf16>, vector<8x128xbf16>, vector<8x128xf32> -> vector<8x128xf32>
    %40 = arith.addf %39, %0 : vector<8x128xf32>
    %cst_29 = arith.constant dense<0.000000e+00> : vector<8xf32>
    %41 = vector.multi_reduction <add>, %40, %cst_29 [1] : vector<8x128xf32> to vector<8xf32>
    %42 = vector.shape_cast %41 : vector<8xf32> to vector<8x1xf32>
    %cst_30 = arith.constant 3.125000e-02 : f32
    %43 = vector.broadcast %cst_30 : f32 to vector<8x1xf32>
    %44 = arith.mulf %42, %43 : vector<8x1xf32>
    %45 = arith.mulf %40, %40 : vector<8x128xf32>
    %cst_31 = arith.constant dense<0.000000e+00> : vector<8xf32>
    %46 = vector.multi_reduction <add>, %45, %cst_31 [1] : vector<8x128xf32> to vector<8xf32>
    %47 = vector.shape_cast %46 : vector<8xf32> to vector<8x1xf32>
    %cst_32 = arith.constant 3.125000e-02 : f32
    %48 = vector.broadcast %cst_32 : f32 to vector<8x1xf32>
    %49 = arith.mulf %47, %48 : vector<8x1xf32>
    %50 = arith.mulf %44, %44 : vector<8x1xf32>
    %51 = arith.subf %49, %50 : vector<8x1xf32>
    %cst_33 = arith.constant 9.99999974E-6 : f32
    %52 = vector.broadcast %cst_33 : f32 to vector<8x1xf32>
    %53 = arith.addf %51, %52 : vector<8x1xf32>
    %54 = math.rsqrt %53 : vector<8x1xf32>
    %55 = vector.broadcast %44 : vector<8x1xf32> to vector<8x128xf32>
    %56 = arith.subf %40, %55 : vector<8x128xf32>
    %57 = vector.broadcast %54 : vector<8x1xf32> to vector<8x128xf32>
    %58 = arith.mulf %56, %57 : vector<8x128xf32>
    %59 = vector.broadcast %4 : vector<1x128xf32> to vector<8x128xf32>
    %60 = arith.mulf %58, %59 : vector<8x128xf32>
    %61 = vector.broadcast %5 : vector<1x128xf32> to vector<8x128xf32>
    %62 = arith.addf %60, %61 : vector<8x128xf32>
    %63 = arith.truncf %3 : vector<8x128xf32> to vector<8x128xbf16>
    %c0_34 = arith.constant 0 : index
    %c0_35 = arith.constant 0 : index
    %64 = vector.load %arg4[%c0_34, %c0_35] : memref<128x128xbf16, #tpu.memory_space<vmem>>, vector<128x128xbf16>
    %cst_36 = arith.constant dense<0.000000e+00> : vector<8x128xf32>
    %65 = tpu.matmul %63, %64, %cst_36 {dimension_numbers = #tpu.dot_dimension_numbers<[1], [0], [0], [1], [0, 0, 1, 1], [], []>} : vector<8x128xbf16>, vector<128x128xbf16>, vector<8x128xf32> -> vector<8x128xf32>
    %c0_37 = arith.constant 0 : index
    %c0_38 = arith.constant 0 : index
    %66 = vector.load %arg5[%c0_37, %c0_38] : memref<1x128xf32, #tpu.memory_space<vmem>>, vector<1x128xf32>
    %67 = vector.broadcast %66 : vector<1x128xf32> to vector<8x128xf32>
    %68 = arith.addf %65, %67 : vector<8x128xf32>
    %69 = arith.truncf %62 : vector<8x128xf32> to vector<8x128xbf16>
    %c0_39 = arith.constant 0 : index
    %c0_40 = arith.constant 0 : index
    %70 = vector.load %arg6[%c0_39, %c0_40] : memref<128x128xbf16, #tpu.memory_space<vmem>>, vector<128x128xbf16>
    %cst_41 = arith.constant dense<0.000000e+00> : vector<8x128xf32>
    %71 = tpu.matmul %69, %70, %cst_41 {dimension_numbers = #tpu.dot_dimension_numbers<[1], [0], [0], [1], [0, 0, 1, 1], [], []>} : vector<8x128xbf16>, vector<128x128xbf16>, vector<8x128xf32> -> vector<8x128xf32>
    %c0_42 = arith.constant 0 : index
    %c0_43 = arith.constant 0 : index
    %72 = vector.load %arg7[%c0_42, %c0_43] : memref<1x128xf32, #tpu.memory_space<vmem>>, vector<1x128xf32>
    %73 = vector.broadcast %72 : vector<1x128xf32> to vector<8x128xf32>
    %74 = arith.addf %71, %73 : vector<8x128xf32>
    %75 = arith.truncf %62 : vector<8x128xf32> to vector<8x128xbf16>
    %c0_44 = arith.constant 0 : index
    %c0_45 = arith.constant 0 : index
    %76 = vector.load %arg8[%c0_44, %c0_45] : memref<128x128xbf16, #tpu.memory_space<vmem>>, vector<128x128xbf16>
    %cst_46 = arith.constant dense<0.000000e+00> : vector<8x128xf32>
    %77 = tpu.matmul %75, %76, %cst_46 {dimension_numbers = #tpu.dot_dimension_numbers<[1], [0], [0], [1], [0, 0, 1, 1], [], []>} : vector<8x128xbf16>, vector<128x128xbf16>, vector<8x128xf32> -> vector<8x128xf32>
    %c0_47 = arith.constant 0 : index
    %c0_48 = arith.constant 0 : index
    %78 = vector.load %arg9[%c0_47, %c0_48] : memref<1x128xf32, #tpu.memory_space<vmem>>, vector<1x128xf32>
    %79 = vector.broadcast %78 : vector<1x128xf32> to vector<8x128xf32>
    %80 = arith.addf %77, %79 : vector<8x128xf32>
    %81 = arith.truncf %68 : vector<8x128xf32> to vector<8x128xbf16>
    %82 = arith.truncf %74 : vector<8x128xf32> to vector<8x128xbf16>
    %cst_49 = arith.constant dense<0.000000e+00> : vector<8x8xf32>
    %83 = tpu.matmul %81, %82, %cst_49 {dimension_numbers = #tpu.dot_dimension_numbers<[1], [1], [0], [0], [0, 0, 1, 0], [], []>} : vector<8x128xbf16>, vector<8x128xbf16>, vector<8x8xf32> -> vector<8x8xf32>
    %cst_50 = arith.constant dense<0xFF800000> : vector<8xf32>
    %84 = vector.multi_reduction <maximumf>, %83, %cst_50 [1] : vector<8x8xf32> to vector<8xf32>
    %85 = vector.shape_cast %84 : vector<8xf32> to vector<8x1xf32>
    %86 = vector.broadcast %85 : vector<8x1xf32> to vector<8x8xf32>
    %87 = arith.subf %83, %86 : vector<8x8xf32>
    %88 = math.exp %87 : vector<8x8xf32>
    %cst_51 = arith.constant dense<0.000000e+00> : vector<8xf32>
    %89 = vector.multi_reduction <add>, %88, %cst_51 [1] : vector<8x8xf32> to vector<8xf32>
    %90 = vector.shape_cast %89 : vector<8xf32> to vector<8x1xf32>
    %91 = tpu.reciprocal %90 {approx = true} : vector<8x1xf32> -> vector<8x1xf32>
    %92 = vector.broadcast %91 : vector<8x1xf32> to vector<8x8xf32>
    %93 = arith.mulf %88, %92 : vector<8x8xf32>
    %94 = arith.truncf %93 : vector<8x8xf32> to vector<8x8xbf16>
    %95 = arith.truncf %80 : vector<8x128xf32> to vector<8x128xbf16>
    %cst_52 = arith.constant dense<0.000000e+00> : vector<8x128xf32>
    %96 = tpu.matmul %94, %95, %cst_52 {dimension_numbers = #tpu.dot_dimension_numbers<[1], [0], [0], [1], [0, 0, 1, 1], [], []>} : vector<8x8xbf16>, vector<8x128xbf16>, vector<8x128xf32> -> vector<8x128xf32>
    %97 = arith.addf %96, %3 : vector<8x128xf32>
    %cst_53 = arith.constant dense<0.000000e+00> : vector<8xf32>
    %98 = vector.multi_reduction <add>, %97, %cst_53 [1] : vector<8x128xf32> to vector<8xf32>
    %99 = vector.shape_cast %98 : vector<8xf32> to vector<8x1xf32>
    %cst_54 = arith.constant 3.125000e-02 : f32
    %100 = vector.broadcast %cst_54 : f32 to vector<8x1xf32>
    %101 = arith.mulf %99, %100 : vector<8x1xf32>
    %102 = arith.mulf %97, %97 : vector<8x128xf32>
    %cst_55 = arith.constant dense<0.000000e+00> : vector<8xf32>
    %103 = vector.multi_reduction <add>, %102, %cst_55 [1] : vector<8x128xf32> to vector<8xf32>
    %104 = vector.shape_cast %103 : vector<8xf32> to vector<8x1xf32>
    %cst_56 = arith.constant 3.125000e-02 : f32
    %105 = vector.broadcast %cst_56 : f32 to vector<8x1xf32>
    %106 = arith.mulf %104, %105 : vector<8x1xf32>
    %107 = arith.mulf %101, %101 : vector<8x1xf32>
    %108 = arith.subf %106, %107 : vector<8x1xf32>
    %cst_57 = arith.constant 9.99999974E-6 : f32
    %109 = vector.broadcast %cst_57 : f32 to vector<8x1xf32>
    %110 = arith.addf %108, %109 : vector<8x1xf32>
    %111 = math.rsqrt %110 : vector<8x1xf32>
    %112 = vector.broadcast %101 : vector<8x1xf32> to vector<8x128xf32>
    %113 = arith.subf %97, %112 : vector<8x128xf32>
    %114 = vector.broadcast %111 : vector<8x1xf32> to vector<8x128xf32>
    %115 = arith.mulf %113, %114 : vector<8x128xf32>
    %116 = vector.broadcast %4 : vector<1x128xf32> to vector<8x128xf32>
    %117 = arith.mulf %115, %116 : vector<8x128xf32>
    %118 = vector.broadcast %5 : vector<1x128xf32> to vector<8x128xf32>
    %119 = arith.addf %117, %118 : vector<8x128xf32>
    %120 = arith.truncf %119 : vector<8x128xf32> to vector<8x128xbf16>
    %c0_58 = arith.constant 0 : index
    %c0_59 = arith.constant 0 : index
    %121 = vector.load %arg10[%c0_58, %c0_59] : memref<128x128xbf16, #tpu.memory_space<vmem>>, vector<128x128xbf16>
    %cst_60 = arith.constant dense<0.000000e+00> : vector<8x128xf32>
    %122 = tpu.matmul %120, %121, %cst_60 {dimension_numbers = #tpu.dot_dimension_numbers<[1], [0], [0], [1], [0, 0, 1, 1], [], []>} : vector<8x128xbf16>, vector<128x128xbf16>, vector<8x128xf32> -> vector<8x128xf32>
    %c0_61 = arith.constant 0 : index
    %c0_62 = arith.constant 0 : index
    %123 = vector.load %arg11[%c0_61, %c0_62] : memref<1x128xf32, #tpu.memory_space<vmem>>, vector<1x128xf32>
    %124 = vector.broadcast %123 : vector<1x128xf32> to vector<8x128xf32>
    %125 = arith.addf %122, %124 : vector<8x128xf32>
    %cst_63 = arith.constant 0.000000e+00 : f32
    %126 = vector.broadcast %cst_63 : f32 to vector<8x128xf32>
    %127 = arith.maximumf %125, %126 : vector<8x128xf32>
    %128 = arith.truncf %127 : vector<8x128xf32> to vector<8x128xbf16>
    %c0_64 = arith.constant 0 : index
    %c0_65 = arith.constant 0 : index
    %129 = vector.load %arg12[%c0_64, %c0_65] : memref<128x128xbf16, #tpu.memory_space<vmem>>, vector<128x128xbf16>
    %cst_66 = arith.constant dense<0.000000e+00> : vector<8x128xf32>
    %130 = tpu.matmul %128, %129, %cst_66 {dimension_numbers = #tpu.dot_dimension_numbers<[1], [0], [0], [1], [0, 0, 1, 1], [], []>} : vector<8x128xbf16>, vector<128x128xbf16>, vector<8x128xf32> -> vector<8x128xf32>
    %c0_67 = arith.constant 0 : index
    %c0_68 = arith.constant 0 : index
    %131 = vector.load %arg13[%c0_67, %c0_68] : memref<1x128xf32, #tpu.memory_space<vmem>>, vector<1x128xf32>
    %132 = vector.broadcast %131 : vector<1x128xf32> to vector<8x128xf32>
    %133 = arith.addf %130, %132 : vector<8x128xf32>
    %134 = arith.addf %133, %119 : vector<8x128xf32>
    %cst_69 = arith.constant dense<0.000000e+00> : vector<8xf32>
    %135 = vector.multi_reduction <add>, %134, %cst_69 [1] : vector<8x128xf32> to vector<8xf32>
    %136 = vector.shape_cast %135 : vector<8xf32> to vector<8x1xf32>
    %cst_70 = arith.constant 3.125000e-02 : f32
    %137 = vector.broadcast %cst_70 : f32 to vector<8x1xf32>
    %138 = arith.mulf %136, %137 : vector<8x1xf32>
    %139 = arith.mulf %134, %134 : vector<8x128xf32>
    %cst_71 = arith.constant dense<0.000000e+00> : vector<8xf32>
    %140 = vector.multi_reduction <add>, %139, %cst_71 [1] : vector<8x128xf32> to vector<8xf32>
    %141 = vector.shape_cast %140 : vector<8xf32> to vector<8x1xf32>
    %cst_72 = arith.constant 3.125000e-02 : f32
    %142 = vector.broadcast %cst_72 : f32 to vector<8x1xf32>
    %143 = arith.mulf %141, %142 : vector<8x1xf32>
    %144 = arith.mulf %138, %138 : vector<8x1xf32>
    %145 = arith.subf %143, %144 : vector<8x1xf32>
    %cst_73 = arith.constant 9.99999974E-6 : f32
    %146 = vector.broadcast %cst_73 : f32 to vector<8x1xf32>
    %147 = arith.addf %145, %146 : vector<8x1xf32>
    %148 = math.rsqrt %147 : vector<8x1xf32>
    %149 = vector.broadcast %138 : vector<8x1xf32> to vector<8x128xf32>
    %150 = arith.subf %134, %149 : vector<8x128xf32>
    %151 = vector.broadcast %148 : vector<8x1xf32> to vector<8x128xf32>
    %152 = arith.mulf %150, %151 : vector<8x128xf32>
    %153 = vector.broadcast %4 : vector<1x128xf32> to vector<8x128xf32>
    %154 = arith.mulf %152, %153 : vector<8x128xf32>
    %155 = vector.broadcast %5 : vector<1x128xf32> to vector<8x128xf32>
    %156 = arith.addf %154, %155 : vector<8x128xf32>
    %c0_74 = arith.constant 0 : index
    %c0_75 = arith.constant 0 : index
    %157 = vector.load %arg16[%c0_74, %c0_75] : memref<8x128xf32, #tpu.memory_space<vmem>>, vector<8x128xf32>
    tpu.vector_store %arg16[%c0_74, %c0_75], %156 {strides = array<i32>} : memref<8x128xf32, #tpu.memory_space<vmem>>, vector<8x128xf32>,
    return
  }
}

</mosaic_0001>

<bundles_post_ra>
// kernel: cross_transformer2.1
= control target key start
LH: loop header
LB: loop body
LE: loop exit
PB: predicated region body
PF: predicated region fallthrough
CT: control target
= control target key end

     0   :  { %s1381_s0 = inlined_call_operand.vmem [shape: f32[8,128], index: 0, kind: input, shape index: {}]   ;;  %s1382_s1 = inlined_call_operand.vmem [shape: f32[8,128], index: 1, kind: input, shape index: {}]   ;;  %s1383_s2 = inlined_call_operand.vmem [shape: f32[8,128], index: 2, kind: input, shape index: {}]   ;;  %s1384_s3 = inlined_call_operand.vmem [shape: f32[8,128], index: 3, kind: input, shape index: {}]   ;;  %s1385_s4 = inlined_call_operand.hbm [shape: bf16[128,128], index: 4, kind: input, shape index: {}]   ;;  %s1386_s5 = inlined_call_operand.vmem [shape: f32[1,128], index: 5, kind: input, shape index: {}]   ;;  %s1387_s6 = inlined_call_operand.hbm [shape: bf16[128,128], index: 6, kind: input, shape index: {}]   ;;  %s1388_s7 = inlined_call_operand.vmem [shape: f32[1,128], index: 7, kind: input, shape index: {}]   ;;  %s1389_s8 = inlined_call_operand.hbm [shape: bf16[128,128], index: 8, kind: input, shape index: {}]   ;;  %s1390_s9 = inlined_call_operand.vmem [shape: f32[1,128], index: 9, kind: input, shape index: {}]   ;;  %s1391_s10 = inlined_call_operand.hbm [shape: bf16[128,128], index: 10, kind: input, shape index: {}]   ;;  %s1392_s11 = inlined_call_operand.vmem [shape: f32[1,128], index: 11, kind: input, shape index: {}]   ;;  %s1393_s12 = inlined_call_operand.hbm [shape: bf16[128,128], index: 12, kind: input, shape index: {}]   ;;  %s1394_s13 = inlined_call_operand.vmem [shape: f32[1,128], index: 13, kind: input, shape index: {}]   ;;  %s1395_s14 = inlined_call_operand.vmem [shape: f32[1,128], index: 14, kind: input, shape index: {}]   ;;  %s1396_s15 = inlined_call_operand.vmem [shape: f32[1,128], index: 15, kind: input, shape index: {}]   ;;  %s1397_s16 = inlined_call_operand.hbm [shape: f32[8,128], index: 16, kind: output, shape index: {}]  }
   0x1   :  { %1398 = sst [smem:[#allocation16_spill]] %s1381_s0 }
   0x2   :  { %21 = vsyncpa [#allocation3], 0 }
   0x3   :  { %22 = vsyncpa [#allocation6], 0 }
   0x4   :  { %23 = vsyncpa [#allocation9], 0 }
   0x5   :  { %24 = vsyncpa [#allocation4], 0  ;;  %s52_s23 = sshll.u32 %s1387_s6, 4  ;;  %s1169_s24 = smov [#allocation5]   ;;  %s53_s23 = int_to_ptr.hbm [resolvable:$true] %s52_s23 }
   0x6   :  { %s54_s25 = sshll.u32 %s1169_s24, 4  ;;  %s82_s28 = sshll.u32 %s1391_s10, 4  ;;  %s55_s25 = int_to_ptr.vmem [resolvable:$true] %s54_s25  ;;  %s83_s28 = int_to_ptr.hbm [resolvable:$true] %s82_s28 }
   0x7   :  { %s1170_s29 = smov 64   ;;  %s1171_s30 = smov 4  }
   0x8   :  { %60 = dma.hbm_to_vmem [thread:$0]  %s53_s23, 1024, %s55_s25, [#allocation6], %s1170_s29, %s1170_s29, %s1171_s30  }
   0x9   :  { %s1172_s0 = smov [#allocation8]   ;;  %s37_s20 = sshll.u32 %s1385_s4, 4  ;;  %s38_s20 = int_to_ptr.hbm [resolvable:$true] %s37_s20 }
   0xa   :  { %s84_s17 = sshll.u32 %s1172_s0, 4  ;;  %s67_s22 = sshll.u32 %s1389_s8, 4  ;;  %s85_s17 = int_to_ptr.vmem [resolvable:$true] %s84_s17  ;;  %s68_s22 = int_to_ptr.hbm [resolvable:$true] %s67_s22 }
   0xb   :  { %90 = dma.hbm_to_vmem [thread:$0]  %s83_s28, 1024, %s85_s17, [#allocation9], %s1170_s29, %s1170_s29, %s1171_s30  }
   0xc   :  { %s1173_s24 = smov [#allocation2]   ;;  %s1174_s10 = smov [#allocation7]  }
   0xd   :  { %s39_s26 = sshll.u32 %s1173_s24, 4  ;;  %s69_s23 = sshll.u32 %s1174_s10, 4  ;;  %s40_s26 = int_to_ptr.vmem [resolvable:$true] %s39_s26  ;;  %s70_s23 = int_to_ptr.vmem [resolvable:$true] %s69_s23 }
   0xe   :  { %45 = dma.hbm_to_vmem [thread:$0]  %s38_s20, 1024, %s40_s26, [#allocation3], %s1170_s29, %s1170_s29, %s1171_s30  }
   0xf   :  { %s97_s0 = sshll.u32 %s1393_s12, 4  ;;  %s1175_s4 = smov [#allocation10]   ;;  %s98_s0 = int_to_ptr.hbm [resolvable:$true] %s97_s0 }
  0x10   :  { %75 = dma.hbm_to_vmem [thread:$0]  %s68_s22, 1024, %s70_s23, [#allocation6], %s1170_s29, %s1170_s29, %s1171_s30  }
  0x11   :  { %s99_s28 = sshll.u32 %s1175_s4, 4  ;;  %s100_s28 = int_to_ptr.vmem [resolvable:$true] %s99_s28 }
  0x12   :  { %105 = dma.hbm_to_vmem [thread:$0]  %s98_s0, 1024, %s100_s28, [#allocation9], %s1170_s29, %s1170_s29, %s1171_s30  }
  0x13   :  { %1161 = dma.done.wait [#allocation3], 1024  }
  0x14   :  { %1162 = vsyncadd [#allocation3], 4294966272 }
  0x15   :  { %1163 = dma.done.wait [#allocation6], 2048  }
  0x16   :  { %1164 = vsyncadd [#allocation6], 4294965248 }
  0x17   :  { %1165 = dma.done.wait [#allocation9], 2048  }
  0x18   :  { %1166 = vsyncadd [#allocation9], 4294965248  ;;  %v1277_v0 = vld [vmem:[#allocation2 + $0x38] sm:$0xff]  ;;  %v1280_v2 = vld [vmem:[#allocation2 + $0x30] sm:$0xff]  ;;  %s1399_s29 = sld [smem:[#allocation16_spill]]  ;;  %vm400_vm0 = vcmask 64512  }
  0x19   :  { %v963_v1 = vld [vmem:[#allocation5 + $0x38] sm:$0xff]  ;;  %208 = vmatpush.bf16.msra.mxu0 %v1277_v0  ;;  %v962_v3 = vld [vmem:[#allocation5 + $0x30] sm:$0xff]  ;;  %v1282_v4 = vld [vmem:[#allocation2 + $0x28] sm:$0xff]  ;;  %vm417_vm1 = vcmask 1043456   ;;  %s774_s0 = sshll.u32 %s1397_s16, 4  ;;  %s775_s0 = int_to_ptr.hbm [resolvable:$true] %s774_s0 }
  0x1a   :  { %290 = vmatpush.bf16.msra.mxu1 %v963_v1  ;;  %v961_v5 = vld [vmem:[#allocation5 + $0x28] sm:$0xff]  ;;  %v1286_v6 = vld [vmem:[#allocation2 + $0x20] sm:$0xff]  ;;  %v1289_v8 = vld [vmem:[#allocation2 + $0x18] sm:$0xff] }
  0x1b   :  { %v960_v7 = vld [vmem:[#allocation5 + $0x20] sm:$0xff]  ;;  %v959_v9 = vld [vmem:[#allocation5 + $0x18] sm:$0xff]  ;;  %v1292_v10 = vld [vmem:[#allocation2 + $0x10] sm:$0xff] }
  0x1c   :  { %v958_v11 = vld [vmem:[#allocation5 + $0x10] sm:$0xff]  ;;  %v1295_v12 = vld [vmem:[#allocation2 + $0x8] sm:$0xff]  ;;  %v1297_v14 = vld [vmem:[#allocation2] sm:$0xff] }
  0x1d   :  { %209 = vmatpush.bf16.msra.mxu0 %v1280_v2  ;;  %v957_v13 = vld [vmem:[#allocation5 + $0x8] sm:$0xff]  ;;  %v956_v15 = vld [vmem:[#allocation5] sm:$0xff]  ;;  %v971_v30 = vld [vmem:[#allocation7 + $0x38] sm:$0xff] }
  0x1e   :  { %291 = vmatpush.bf16.msra.mxu1 %v962_v3  ;;  %v1303_v16 = vld [vmem:[%s1399_s29] sm:$0xff]  ;;  %372 = vmatpush.bf16.msra.mxu2 %v971_v30  ;;  %v970_v31 = vld [vmem:[#allocation7 + $0x30] sm:$0xff]  ;;  %v969_v32 = vld [vmem:[#allocation7 + $0x28] sm:$0xff] }
  0x1f   :  { %v134_v17 = vld [vmem:[%s1382_s1] sm:$0xff]  ;;  %v139_v18 = vpack.c.bf16 %v1303_v16, %v1303_v16  ;;  %v967_v34 = vld [vmem:[#allocation7 + $0x18] sm:$0xff]  ;;  %v966_v35 = vld [vmem:[#allocation7 + $0x10] sm:$0xff] }
  0x20   :  { %v221_v19 = vpack.c.bf16 %v134_v17, %v134_v17  ;;  %v1314_v20 = vld [vmem:[%s1388_s7] ss:$0 sm:$0xff]  ;;  %v965_v36 = vld [vmem:[#allocation7 + $0x8] sm:$0xff] }
  0x21   :  { %210 = vmatpush.bf16.msra.mxu0 %v1282_v4  ;;  %v1319_v21 = vld [vmem:[%s1386_s5] ss:$0 sm:$0xff] }
  0x22   :  { %292 = vmatpush.bf16.msra.mxu1 %v961_v5  ;;  %373 = vmatpush.bf16.msra.mxu2 %v970_v31  ;;  %v968_v33 = vld [vmem:[#allocation7 + $0x20] sm:$0xff] }
  0x23   :  { %v964_v39 = vld [vmem:[#allocation7] sm:$0xff] }
  0x24   :  { %v135_v40 = vld [vmem:[%s1383_s2] sm:$0xff] }
  0x25   :  { %211 = vmatpush.bf16.msra.mxu0 %v1286_v6  ;;  %v303_v41 = vpack.c.bf16 %v135_v40, %v135_v40  ;;  %v998_v50 = vld [vmem:[%s1390_s9] ss:$0 sm:$0xff] }
  0x26   :  { %293 = vmatpush.bf16.msra.mxu1 %v960_v7  ;;  %374 = vmatpush.bf16.msra.mxu2 %v969_v32  ;;  %v1345_v62 = vld [vmem:[%s1384_s3] sm:$0xff] }
  0x27   :  { %v1357_v17 = vld [vmem:[%s1396_s15] ss:$0 sm:$0xff] }
  0x29   :  { %212 = vmatpush.bf16.msra.mxu0 %v1289_v8 }
  0x2a   :  { %294 = vmatpush.bf16.msra.mxu1 %v959_v9  ;;  %375 = vmatpush.bf16.msra.mxu2 %v968_v33 }
  0x2d   :  { %213 = vmatpush.bf16.msra.mxu0 %v1292_v10 }
  0x2e   :  { %295 = vmatpush.bf16.msra.mxu1 %v958_v11  ;;  %376 = vmatpush.bf16.msra.mxu2 %v967_v34 }
  0x31   :  { %214 = vmatpush.bf16.msra.mxu0 %v1295_v12 }
  0x32   :  { %296 = vmatpush.bf16.msra.mxu1 %v957_v13  ;;  %377 = vmatpush.bf16.msra.mxu2 %v966_v35 }
  0x35   :  { %215 = vmatpush.bf16.msra.mxu0 %v1297_v14 }
  0x36   :  { %297 = vmatpush.bf16.msra.mxu1 %v956_v15  ;;  %378 = vmatpush.bf16.msra.mxu2 %v965_v36 }
  0x38   :  { %216 = vmatmul.bf16.vlgmr.msra.gmra.mxu0 %v139_v18 }
  0x39   :  { %479 = vmatpush.bf16.msrb.mxu0 %v963_v1  ;;  %298 = vmatmul.bf16.vlgmr.msra.gmra.mxu1 %v221_v19 }
  0x3a   :  { %492 = vmatpush.bf16.msrb.mxu1 %v971_v30  ;;  %379 = vmatpush.bf16.msra.mxu2 %v964_v39 }
  0x3d   :  { %480 = vmatpush.bf16.msrb.mxu0 %v962_v3  ;;  %380 = vmatmul.bf16.vlgmr.msra.gmra.mxu2 %v303_v41 }
  0x3e   :  { %493 = vmatpush.bf16.msrb.mxu1 %v970_v31 }
  0x41   :  { %481 = vmatpush.bf16.msrb.mxu0 %v961_v5 }
  0x42   :  { %494 = vmatpush.bf16.msrb.mxu1 %v969_v32 }
  0x45   :  { %482 = vmatpush.bf16.msrb.mxu0 %v960_v7 }
  0x46   :  { %495 = vmatpush.bf16.msrb.mxu1 %v968_v33 }
  0x49   :  { %483 = vmatpush.bf16.msrb.mxu0 %v959_v9 }
  0x4a   :  { %496 = vmatpush.bf16.msrb.mxu1 %v967_v34 }
  0x4d   :  { %484 = vmatpush.bf16.msrb.mxu0 %v958_v11 }
  0x4e   :  { %497 = vmatpush.bf16.msrb.mxu1 %v966_v35 }
  0x51   :  { %485 = vmatpush.bf16.msrb.mxu0 %v957_v13 }
  0x52   :  { %498 = vmatpush.bf16.msrb.mxu1 %v965_v36 }
  0x55   :  { %486 = vmatpush.bf16.msrb.mxu0 %v956_v15 }
  0x56   :  { %499 = vmatpush.bf16.msrb.mxu1 %v964_v39 }
  0xb5   :  { %v217_v22 = vpop.f32.mrf.mxu0 }
  0xb6   :  { %v299_v23 = vpop.f32.mrf.mxu1  ;;  %v218_v26 = vadd.f32 %v1319_v21, %v217_v22 }
  0xb7   :  { %v300_v24 = vadd.f32 %v1314_v20, %v299_v23 }
  0xb8   :  { %v385_v27 = vpack.c.bf16 %v218_v26, %v218_v26 }
  0xb9   :  { %v386_v25 = vpack.c.bf16 %v300_v24, %v300_v24 }
  0xbb   :  { %394 = vmatpush.bf16.xpose.msra.mxu3 %v386_v25 }
  0xbd   :  { %v219_v28 = vpop.f32.mrf.mxu0 }
  0xbe   :  { %v301_v29 = vpop.f32.mrf.mxu1 }
  0xc0   :  { %v381_v48 = vpop.f32.mrf.mxu2 }
  0xc1   :  { %v382_v51 = vadd.f32 %v998_v50, %v381_v48 }
  0xc2   :  { %395 = vmatmul.bf16.vlgmr.msra.gmra.mxu3 %v385_v27 }
  0xc3   :  { %v413_v52 = vpack.c.bf16 %v382_v51, %v382_v51  ;;  %v978_v51 = vld [vmem:[#allocation8 + $0x30] sm:$0xff] }
  0xc5   :  { %v419_v53 = vsel %vm417_vm1, %v413_v52, 0  ;;  %v977_v52 = vld [vmem:[#allocation8 + $0x28] sm:$0xff] }
  0xc6   :  { %428 = vmatpush.bf16.msrb.mxu3 %v419_v53  ;;  %v976_v53 = vld [vmem:[#allocation8 + $0x20] sm:$0xff] }
  0xc8   :  { %v383_v49 = vpop.f32.mrf.mxu2 }
  0xca   :  { %465 = vmatpush.bf16.msra.mxu3 %v1277_v0  ;;  %v464_v0 = vpack.c.bf16 %v1345_v62, %v1345_v62 }
  0xce   :  { %466 = vmatpush.bf16.msra.mxu3 %v1280_v2 }
  0xd2   :  { %467 = vmatpush.bf16.msra.mxu3 %v1282_v4 }
  0xd6   :  { %468 = vmatpush.bf16.msra.mxu3 %v1286_v6 }
  0xda   :  { %469 = vmatpush.bf16.msra.mxu3 %v1289_v8 }
  0xde   :  { %470 = vmatpush.bf16.msra.mxu3 %v1292_v10 }
  0xe2   :  { %471 = vmatpush.bf16.msra.mxu3 %v1295_v12 }
  0xe6   :  { %472 = vmatpush.bf16.msra.mxu3 %v1297_v14  ;;  %v1352_v14 = vld [vmem:[%s1395_s14] ss:$0 sm:$0xff] }
 0x145   :  { %v396_v37 = vpop.f32.mrf.mxu3 }
 0x146   :  { %v401_v38 = vsel %vm400_vm0, %v396_v37, -inf }
 0x147   :  { %402 = vmax.xlane.f32.xlu0 %v401_v38 }
 0x14d   :  { %v398_v42 = vpop.f32.mrf.mxu3 }
 0x1ba   :  { %v403_v43 = vpop.xlane.xlu0 %402 }
 0x1bb   :  { %v404_v44 = vsub.f32 %v396_v37, %v403_v43 }
 0x1bd   :  { %v405_v45 = vmul.f32 1.442695, %v404_v44 }
 0x1bf   :  { %1003 = vpow2.f32 %v405_v45 }
 0x1c5   :  { %v1004_v46 = vpop.eup %1003 }
 0x1c6   :  { %v407_v47 = vsel %vm400_vm0, %v1004_v46, 0.0 }
 0x1c7   :  { %408 = vadd.xlane.f32.xlu0 %v407_v47 }
 0x23a   :  { %v409_v54 = vpop.xlane.xlu0 %408 }
 0x23b   :  { %1005 = vrcp.f32 %v409_v54  ;;  %v975_v54 = vld [vmem:[#allocation8 + $0x18] sm:$0xff] }
 0x241   :  { %v1006_v55 = vpop.eup %1005 }
 0x242   :  { %v411_v56 = vmul.f32 %v1006_v55, %v1004_v46  ;;  %v974_v55 = vld [vmem:[#allocation8 + $0x10] sm:$0xff] }
 0x244   :  { %v412_v57 = vpack.c.bf16 %v411_v56, %v411_v56  ;;  %v973_v56 = vld [vmem:[#allocation8 + $0x8] sm:$0xff] }
 0x246   :  { %882 = vmatmul.msk.bf16.vlgmr.msrb.gmra.mxu3 %vm400_vm0, %v412_v57  ;;  %v972_v57 = vld [vmem:[#allocation8] sm:$0xff] }
 0x256   :  { %473 = vmatmul.bf16.vlgmr.msra.gmra.mxu3 %v464_v0 }
 0x2c9   :  { %v430_v58 = vpop.f32.mrf.mxu3 }
 0x2ca   :  { %v431_v59 = vadd.f32 %v430_v58, %v1303_v16 }
 0x2cc   :  { %434 = vadd.xlane.f32.xlu1 %v431_v59  ;;  %v437_v61 = vmul.f32 %v431_v59, %v431_v59 }
 0x2d1   :  { %v432_v60 = vpop.f32.mrf.mxu3 }
 0x2d4   :  { %438 = vadd.xlane.f32.xlu1 %v437_v61 }
 0x2d9   :  { %v474_v23 = vpop.f32.mrf.mxu3 }
 0x2da   :  { %v475_v31 = vadd.f32 %v1319_v21, %v474_v23  ;;  %v981_v23 = vld [vmem:[#allocation10 + $0x8] sm:$0xff] }
 0x2dc   :  { %v505_v33 = vpack.c.bf16 %v475_v31, %v475_v31  ;;  %v1002_v31 = vld [vmem:[%s1394_s13] ss:$0 sm:$0xff] }
 0x2e1   :  { %v476_v24 = vpop.f32.mrf.mxu3 }
 0x2e2   :  { %v980_v24 = vld [vmem:[#allocation10] sm:$0xff] }
 0x33f   :  { %v435_v63 = vpop.xlane.xlu1 %434 }
 0x340   :  { %v436_v1 = vmul.f32 0.03125, %v435_v63  ;;  %v987_v63 = vld [vmem:[#allocation10 + $0x38] sm:$0xff] }
 0x341   :  { %728 = vmatpush.bf16.msra.mxu0 %v987_v63 }
 0x342   :  { %v441_v3 = vmul.f32 %v436_v1, %v436_v1  ;;  %v454_v13 = vsub.f32 %v431_v59, %v436_v1  ;;  %v986_v1 = vld [vmem:[#allocation10 + $0x30] sm:$0xff] }
 0x345   :  { %729 = vmatpush.bf16.msra.mxu0 %v986_v1 }
 0x347   :  { %v439_v2 = vpop.xlane.xlu1 %438 }
 0x348   :  { %v440_v4 = vmul.f32 0.03125, %v439_v2 }
 0x34a   :  { %v442_v5 = vsub.f32 %v440_v4, %v441_v3  ;;  %v985_v3 = vld [vmem:[#allocation10 + $0x28] sm:$0xff]  ;;  %v984_v4 = vld [vmem:[#allocation10 + $0x20] sm:$0xff] }
 0x34b   :  { %730 = vmatpush.bf16.msra.mxu0 %v985_v3 }
 0x34c   :  { %v443_v6 = vadd.f32 1e-05, %v442_v5 }
 0x34e   :  { %1007 = vrsqrt.f32 %v443_v6  ;;  %vm450_vm3 = vweird.f32 %v443_v6 }
 0x34f   :  { %731 = vmatpush.bf16.msra.mxu0 %v984_v4 }
 0x354   :  { %v1008_v7 = vpop.eup %1007 }
 0x355   :  { %v445_v8 = vmul.f32 %v1008_v7, %v443_v6  ;;  %vm451_vm2 = vweird.f32 %v1008_v7 }
 0x356   :  { %vm452_vm4 = vmor %vm450_vm3, %vm451_vm2 }
 0x357   :  { %v446_v9 = vmul.f32 %v1008_v7, %v445_v8 }
 0x359   :  { %v447_v10 = vmul.f32 0.5, %v446_v9 }
 0x35b   :  { %v448_v11 = vsub.f32 1.5, %v447_v10  ;;  %v982_v10 = vld [vmem:[#allocation10 + $0x10] sm:$0xff] }
 0x35d   :  { %v449_v12 = vmul.f32 %v1008_v7, %v448_v11 }
 0x35f   :  { %v453_v15 = vsel %vm452_vm4, %v1008_v7, %v449_v12  ;;  %v983_v7 = vld [vmem:[#allocation10 + $0x18] sm:$0xff] }
 0x360   :  { %v455_v16 = vmul.f32 %v454_v13, %v453_v15  ;;  %732 = vmatpush.bf16.msra.mxu0 %v983_v7 }
 0x362   :  { %v459_v18 = vmul.f32 %v1352_v14, %v455_v16 }
 0x364   :  { %v463_v19 = vadd.f32 %v1357_v17, %v459_v18  ;;  %733 = vmatpush.bf16.msra.mxu0 %v982_v10 }
 0x366   :  { %v478_v22 = vpack.c.bf16 %v463_v19, %v463_v19 }
 0x368   :  { %487 = vmatmul.bf16.vlgmr.msrb.gmra.mxu0 %v478_v22  ;;  %500 = vmatmul.bf16.vlgmr.msrb.gmra.mxu1 %v478_v22 }
 0x369   :  { %734 = vmatpush.bf16.msra.mxu0 %v981_v23 }
 0x36d   :  { %735 = vmatpush.bf16.msra.mxu0 %v980_v24 }
 0x3e5   :  { %v488_v25 = vpop.f32.mrf.mxu0  ;;  %v501_v26 = vpop.f32.mrf.mxu1 }
 0x3e6   :  { %v489_v27 = vadd.f32 %v1314_v20, %v488_v25  ;;  %v502_v28 = vadd.f32 %v998_v50, %v501_v26  ;;  %v979_v50 = vld [vmem:[#allocation8 + $0x38] sm:$0xff]  ;;  %v1001_v25 = vld [vmem:[%s1392_s11] ss:$0 sm:$0xff]  ;;  %s1176_s11 = smov [#allocation11]  }
 0x3e7   :  { %645 = vmatpush.bf16.msrb.mxu3 %v979_v50  ;;  %s772_s13 = sshll.u32 %s1176_s11, 4  ;;  %s773_s13 = int_to_ptr.vmem [resolvable:$true] %s772_s13 }
 0x3e8   :  { %v506_v29 = vpack.c.bf16 %v489_v27, %v489_v27  ;;  %v532_v30 = vpack.c.bf16 %v502_v28, %v502_v28 }
 0x3ea   :  { %v537_v32 = vsel %vm417_vm1, %v532_v30, 0  ;;  %514 = vmatpush.bf16.xpose.msrb.mxu2 %v506_v29 }
 0x3eb   :  { %646 = vmatpush.bf16.msrb.mxu3 %v978_v51 }
 0x3ed   :  { %v490_v34 = vpop.f32.mrf.mxu0  ;;  %v503_v35 = vpop.f32.mrf.mxu1 }
 0x3ef   :  { %647 = vmatpush.bf16.msrb.mxu3 %v977_v52 }
 0x3f1   :  { %515 = vmatmul.bf16.vlgmr.msrb.gmra.mxu2 %v505_v33 }
 0x3f2   :  { %546 = vmatpush.bf16.msra.mxu2 %v537_v32 }
 0x3f3   :  { %648 = vmatpush.bf16.msrb.mxu3 %v976_v53 }
 0x3f7   :  { %649 = vmatpush.bf16.msrb.mxu3 %v975_v54 }
 0x3fb   :  { %650 = vmatpush.bf16.msrb.mxu3 %v974_v55 }
 0x3ff   :  { %651 = vmatpush.bf16.msrb.mxu3 %v973_v56 }
 0x403   :  { %652 = vmatpush.bf16.msrb.mxu3 %v972_v57 }
 0x474   :  { %v516_v36 = vpop.f32.mrf.mxu2 }
 0x475   :  { %v520_v37 = vsel %vm400_vm0, %v516_v36, -inf }
 0x476   :  { %521 = vmax.xlane.f32.xlu2 %v520_v37 }
 0x47c   :  { %v518_v38 = vpop.f32.mrf.mxu2 }
 0x4e9   :  { %v522_v39 = vpop.xlane.xlu2 %521 }
 0x4ea   :  { %v523_v20 = vsub.f32 %v516_v36, %v522_v39 }
 0x4ec   :  { %v524_v40 = vmul.f32 1.442695, %v523_v20 }
 0x4ee   :  { %1009 = vpow2.f32 %v524_v40 }
 0x4f4   :  { %v1010_v41 = vpop.eup %1009 }
 0x4f5   :  { %v526_v21 = vsel %vm400_vm0, %v1010_v41, 0.0 }
 0x4f6   :  { %527 = vadd.xlane.f32.xlu2 %v526_v21 }
 0x569   :  { %v528_v42 = vpop.xlane.xlu2 %527 }
 0x56a   :  { %1011 = vrcp.f32 %v528_v42 }
 0x570   :  { %v1012_v43 = vpop.eup %1011 }
 0x571   :  { %v530_v44 = vmul.f32 %v1012_v43, %v1010_v41 }
 0x573   :  { %v531_v45 = vpack.c.bf16 %v530_v44, %v530_v44 }
 0x575   :  { %883 = vmatmul.msk.bf16.vlgmr.msra.gmra.mxu2 %vm400_vm0, %v531_v45 }
 0x5f8   :  { %v548_v46 = vpop.f32.mrf.mxu2 }
 0x5f9   :  { %v549_v47 = vadd.f32 %v548_v46, %v1345_v62 }
 0x5fb   :  { %552 = vadd.xlane.f32.xlu0 %v549_v47  ;;  %v555_v48 = vmul.f32 %v549_v47, %v549_v47 }
 0x5fd   :  { %556 = vadd.xlane.f32.xlu1 %v555_v48 }
 0x600   :  { %v550_v49 = vpop.f32.mrf.mxu2 }
 0x66e   :  { %v553_v58 = vpop.xlane.xlu0 %552 }
 0x66f   :  { %v554_v59 = vmul.f32 0.03125, %v553_v58 }
 0x670   :  { %v557_v60 = vpop.xlane.xlu1 %556 }
 0x671   :  { %v559_v61 = vmul.f32 %v554_v59, %v554_v59  ;;  %v558_v62 = vmul.f32 0.03125, %v557_v60  ;;  %v572_v13 = vsub.f32 %v549_v47, %v554_v59 }
 0x673   :  { %v560_v0 = vsub.f32 %v558_v62, %v559_v61 }
 0x675   :  { %v561_v2 = vadd.f32 1e-05, %v560_v0 }
 0x677   :  { %1013 = vrsqrt.f32 %v561_v2  ;;  %vm568_vm6 = vweird.f32 %v561_v2 }
 0x67d   :  { %v1014_v5 = vpop.eup %1013 }
 0x67e   :  { %v563_v6 = vmul.f32 %v1014_v5, %v561_v2  ;;  %vm569_vm5 = vweird.f32 %v1014_v5 }
 0x67f   :  { %vm570_vm7 = vmor %vm568_vm6, %vm569_vm5 }
 0x680   :  { %v564_v8 = vmul.f32 %v1014_v5, %v563_v6 }
 0x682   :  { %v565_v9 = vmul.f32 0.5, %v564_v8 }
 0x684   :  { %v566_v11 = vsub.f32 1.5, %v565_v9 }
 0x686   :  { %v567_v12 = vmul.f32 %v1014_v5, %v566_v11 }
 0x688   :  { %v571_v15 = vsel %vm570_vm7, %v1014_v5, %v567_v12 }
 0x689   :  { %v573_v16 = vmul.f32 %v572_v13, %v571_v15 }
 0x68b   :  { %v574_v18 = vmul.f32 %v1352_v14, %v573_v16 }
 0x68d   :  { %v575_v19 = vadd.f32 %v1357_v17, %v574_v18 }
 0x68f   :  { %v576_v22 = vpack.c.bf16 %v575_v19, %v575_v19 }
 0x691   :  { %653 = vmatmul.bf16.vlgmr.msrb.gmra.mxu3 %v576_v22 }
 0x714   :  { %v654_v26 = vpop.f32.mrf.mxu3 }
 0x715   :  { %v655_v27 = vadd.f32 %v1001_v25, %v654_v26 }
 0x717   :  { %v658_v28 = vmax.f32 %v655_v27, 0.0 }
 0x719   :  { %v659_v29 = vpack.c.bf16 %v658_v28, %v658_v28 }
 0x71b   :  { %736 = vmatmul.bf16.vlgmr.msra.gmra.mxu0 %v659_v29 }
 0x71c   :  { %v656_v30 = vpop.f32.mrf.mxu3 }
 0x798   :  { %v737_v32 = vpop.f32.mrf.mxu0 }
 0x799   :  { %v738_v33 = vadd.f32 %v1002_v31, %v737_v32 }
 0x79b   :  { %v741_v34 = vadd.f32 %v738_v33, %v575_v19 }
 0x79d   :  { %742 = vadd.xlane.f32.xlu2 %v741_v34  ;;  %v745_v35 = vmul.f32 %v741_v34, %v741_v34 }
 0x79f   :  { %746 = vadd.xlane.f32.xlu0 %v745_v35 }
 0x7a0   :  { %v739_v36 = vpop.f32.mrf.mxu0 }
 0x810   :  { %v743_v37 = vpop.xlane.xlu2 %742 }
 0x811   :  { %v744_v38 = vmul.f32 0.03125, %v743_v37 }
 0x812   :  { %v747_v39 = vpop.xlane.xlu0 %746 }
 0x813   :  { %v749_v20 = vmul.f32 %v744_v38, %v744_v38  ;;  %v748_v40 = vmul.f32 0.03125, %v747_v39  ;;  %v762_v48 = vsub.f32 %v741_v34, %v744_v38 }
 0x815   :  { %v750_v41 = vsub.f32 %v748_v40, %v749_v20 }
 0x817   :  { %v751_v21 = vadd.f32 1e-05, %v750_v41 }
 0x819   :  { %1015 = vrsqrt.f32 %v751_v21  ;;  %vm758_vm9 = vweird.f32 %v751_v21 }
 0x81f   :  { %v1016_v42 = vpop.eup %1015 }
 0x820   :  { %v753_v43 = vmul.f32 %v1016_v42, %v751_v21  ;;  %vm759_vm8 = vweird.f32 %v1016_v42 }
 0x821   :  { %vm760_vm10 = vmor %vm758_vm9, %vm759_vm8 }
 0x822   :  { %v754_v44 = vmul.f32 %v1016_v42, %v753_v43 }
 0x824   :  { %v755_v45 = vmul.f32 0.5, %v754_v44 }
 0x826   :  { %v756_v46 = vsub.f32 1.5, %v755_v45 }
 0x828   :  { %v757_v47 = vmul.f32 %v1016_v42, %v756_v46 }
 0x82a   :  { %v761_v49 = vsel %vm760_vm10, %v1016_v42, %v757_v47 }
 0x82b   :  { %v763_v50 = vmul.f32 %v762_v48, %v761_v49 }
 0x82d   :  { %v764_v51 = vmul.f32 %v1352_v14, %v763_v50 }
 0x82f   :  { %v765_v52 = vadd.f32 %v1357_v17, %v764_v51 }
 0x831   :  { %766 = vst [vmem:[#allocation11] sm:$0xff] %v765_v52 }
 0x832   :  { %777 = dma.vmem_to_hbm [thread:$0]  %s773_s13, 128, %s775_s0, [#allocation4]  }
 0x833   :  { %1167 = dma.done.wait [#allocation4], 128  }
 0x834   :  { %1168 = vsyncadd [#allocation4], 4294967168 }
 0x835   :  { %782 = vsyncpa [#allocation3], 1 }
 0x836   :  { %783 = vsyncpa [#allocation6], 1 }
 0x837   :  { %784 = vsyncpa [#allocation9], 1 }
 0x838   :  { %785 = vsyncpa [#allocation4], 1 }

</bundles_post_ra>
